<compile_context>
chip_gen: v7x
topology: tpu7x:2x2x1
jax: 0.10.0
libtpu: 0.0.40
codegen_flags: <defaults>
</compile_context>

<pallas_src>
import functools

import jax
import jax.numpy as jnp
from jax.experimental import pallas as pl
from jax.experimental.pallas import tpu as pltpu

LANES = 128
SUBLANES = 8
MAX_BLOCK_ROWS = 2048  # 2048 x 128 f32 = 1 MiB per input tile (VMEM-safe on v5e/v6e/v7x)


def _focal_loss_kernel(x_ref, t_ref, out_ref, *, gamma, alpha, n_valid,
                       block_rows, needs_mask):
    x = x_ref[...].astype(jnp.float32)
    t = t_ref[...].astype(jnp.int32)          # int8 on the wire, widen in-register
    t1 = t == 1

    # selected-class logit z = x if target==1 else -x ; logits are [-x, x]
    z = jnp.where(t1, x, -x)
    ax = jnp.abs(x)                            # == |z|
    e = jnp.exp(-2.0 * ax)                     # in (0, 1]; the only exp we pay
    # stable logsumexp(-x, x) = |x| + log1p(exp(-2|x|))
    logpt = z - (ax + jnp.log1p(e))
    # pt = softmax prob of selected class = sigmoid(2z); reuse e (no second exp)
    r = 1.0 / (1.0 + e)
    pt = jnp.where(z >= 0.0, r, e * r)

    if alpha is not None:
        a0 = jnp.float32(alpha[0])
        a1 = jnp.float32(alpha[1])
        logpt = logpt * jnp.where(t1, a1, a0)

    g = float(gamma)
    if g == 0.0:
        loss = -logpt
    else:
        omp = 1.0 - pt
        if g.is_integer() and 1.0 <= g <= 8.0:
            # common case (gamma == 2): repeated multiply, no exp/log pair
            w = omp
            for _ in range(int(g) - 1):
                w = w * omp
        else:
            w = jnp.power(omp, jnp.float32(g))
        loss = -w * logpt

    def _partial(v):
        # (block_rows, 128) -> (8, 128): VPU adds over groups of 8 sublane rows
        return jnp.sum(v.reshape(block_rows // SUBLANES, SUBLANES, LANES), axis=0)

    if needs_mask:
        i = pl.program_id(0)
        is_last = i == pl.num_programs(0) - 1

        @pl.when(is_last)
        def _():
            row = jax.lax.broadcasted_iota(jnp.int32, x.shape, 0) + i * block_rows
            col = jax.lax.broadcasted_iota(jnp.int32, x.shape, 1)
            flat = row * LANES + col
            out_ref[0] = _partial(jnp.where(flat < n_valid, loss, 0.0))

        @pl.when(jnp.logical_not(is_last))
        def _():
            out_ref[0] = _partial(loss)
    else:
        out_ref[0] = _partial(loss)


def focal_loss(x, target, gamma=0, alpha=None):
    """JAX/Pallas equivalent of FocalLoss(gamma, alpha)(x, target).

    x:      float array, any shape (one logit per element).
    target: integer/bool array (0/1), same shape as x.
    alpha:  None, float (-> [alpha, 1-alpha]) or list/tuple of 2 floats.
    """
    if isinstance(alpha, (float, int)) and not isinstance(alpha, bool):
        alpha = (float(alpha), 1.0 - float(alpha))
    elif isinstance(alpha, (list, tuple)):
        alpha = (float(alpha[0]), float(alpha[1]))

    n = x.size
    x_flat = jnp.ravel(x).astype(jnp.float32)
    t_flat = jnp.ravel(target).astype(jnp.int8)      # 1 B/elem HBM traffic

    chunk = SUBLANES * LANES                         # 1024 elements
    padded = pl.cdiv(n, chunk) * chunk
    if padded != n:                                  # tail-only pad, single op
        x_flat = jnp.pad(x_flat, (0, padded - n))
        t_flat = jnp.pad(t_flat, (0, padded - n))

    rows = padded // LANES                           # multiple of 8
    block_rows = min(MAX_BLOCK_ROWS, rows)           # multiple of 8 (== rows or 2048)
    num_blocks = pl.cdiv(rows, block_rows)
    needs_mask = (padded != n) or (rows % block_rows != 0)

    x2 = x_flat.reshape(rows, LANES)                 # free reshape, no copy
    t2 = t_flat.reshape(rows, LANES)

    kernel = functools.partial(
        _focal_loss_kernel, gamma=gamma, alpha=alpha, n_valid=n,
        block_rows=block_rows, needs_mask=needs_mask)

    partials = pl.pallas_call(
        kernel,
        out_shape=jax.ShapeDtypeStruct((num_blocks, SUBLANES, LANES), jnp.float32),
        grid_spec=pltpu.PrefetchScalarGridSpec(
            num_scalar_prefetch=0,
            grid=(num_blocks,),
            in_specs=[
                pl.BlockSpec((block_rows, LANES), lambda i: (i, 0)),
                pl.BlockSpec((block_rows, LANES), lambda i: (i, 0)),
            ],
            out_specs=pl.BlockSpec((1, SUBLANES, LANES), lambda i: (i, 0, 0)),
        ),
        compiler_params=pltpu.CompilerParams(
            dimension_semantics=("parallel",),       # independent blocks -> megacore OK
            vmem_limit_bytes=32 * 1024 * 1024,
        ),
    )(x2, t2)

    # Tiny final reduction of per-block partials outside the kernel.
    return jnp.sum(partials) / jnp.float32(n)


def _reference_focal_loss(x, target, gamma=0, alpha=None):
    # pure-JAX reference mirroring the PyTorch code
    if isinstance(alpha, (float, int)) and not isinstance(alpha, bool):
        alpha = jnp.array([alpha, 1.0 - alpha], jnp.float32)
    elif isinstance(alpha, (list, tuple)):
        alpha = jnp.array(alpha, jnp.float32)

    xf = jnp.ravel(x).astype(jnp.float32)
    t = jnp.ravel(target).astype(jnp.int32)
    logits = jnp.stack([-xf, xf], axis=-1)
    logp = jax.nn.log_softmax(logits, axis=-1)
    logpt = jnp.take_along_axis(logp, t[:, None], axis=1)[:, 0]
    pt = jnp.exp(logpt)
    if alpha is not None:
        logpt = logpt * alpha[t]
    loss = -((1.0 - pt) ** gamma) * logpt
    return jnp.mean(loss)


if __name__ == "__main__":
    key = jax.random.PRNGKey(0)
    kx, kt, kx2, kt2 = jax.random.split(key, 4)

    # Test 1: NCHW logits, gamma=2, alpha=0.25 (integer-gamma fast path)
    x = jax.random.normal(kx, (2, 4, 16, 16), dtype=jnp.float32)
    target = jax.random.bernoulli(kt, 0.5, (2, 4, 16, 16)).astype(jnp.int32)
    out = jax.block_until_ready(focal_loss(x, target, gamma=2, alpha=0.25))
    ref = _reference_focal_loss(x, target, gamma=2, alpha=0.25)
    assert jnp.allclose(out, ref, rtol=2e-5, atol=1e-6), (out, ref)

    # Test 2: odd size (exercises tail padding + last-block mask), gamma=0, no alpha
    x2 = jax.random.normal(kx2, (3, 5, 7, 9), dtype=jnp.float32)
    t2 = jax.random.bernoulli(kt2, 0.5, (3, 5, 7, 9)).astype(jnp.int32)
    out2 = jax.block_until_ready(focal_loss(x2, t2, gamma=0, alpha=None))
    ref2 = _reference_focal_loss(x2, t2, gamma=0, alpha=None)
    assert jnp.allclose(out2, ref2, rtol=2e-5, atol=1e-6), (out2, ref2)

    # Test 3: non-integer gamma and explicit alpha list (jnp.power path)
    out3 = jax.block_until_ready(focal_loss(x, target, gamma=1.5, alpha=[0.3, 0.7]))
    ref3 = _reference_focal_loss(x, target, gamma=1.5, alpha=[0.3, 0.7])
    assert jnp.allclose(out3, ref3, rtol=2e-5, atol=1e-6), (out3, ref3)

    print("KERNEL_OK")
</pallas_src>

<mosaic_0001>
module attributes {stable_mosaic.version = 11 : i64} {
  func.func @_focal_loss_kernel(%arg0: i32, %arg1: memref<16x128xf32, #tpu.memory_space<vmem>>, %arg2: memref<16x128xi8, #tpu.memory_space<vmem>>, %arg3: memref<1x8x128xf32, #tpu.memory_space<vmem>>) attributes {dimension_semantics = [#tpu.dimension_semantics<parallel>], iteration_bounds = array<i64: 1>, scalar_prefetch = 0 : i64, scratch_operands = 0 : i64, tpu.core_type = #tpu.core_type<tc>, window_params = [{transform_indices = @transform_0, window_bounds = array<i64: 16, 128>}, {transform_indices = @transform_1, window_bounds = array<i64: 16, 128>}, {transform_indices = @transform_2, window_bounds = array<i64: 1, 8, 128>}]} {
    %c0 = arith.constant 0 : index
    %c0_0 = arith.constant 0 : index
    %0 = vector.load %arg1[%c0, %c0_0] : memref<16x128xf32, #tpu.memory_space<vmem>>, vector<16x128xf32>
    %c0_1 = arith.constant 0 : index
    %c0_2 = arith.constant 0 : index
    %1 = vector.load %arg2[%c0_1, %c0_2] : memref<16x128xi8, #tpu.memory_space<vmem>>, vector<16x128xi8>
    %2 = arith.extsi %1 : vector<16x128xi8> to vector<16x128xi32>
    %c1_i32 = arith.constant 1 : i32
    %3 = vector.broadcast %c1_i32 : i32 to vector<16x128xi32>
    %4 = arith.cmpi eq, %2, %3 : vector<16x128xi32>
    %cst = arith.constant 0.000000e+00 : f32
    %5 = vector.broadcast %cst : f32 to vector<16x128xf32>
    %6 = arith.subf %5, %0 : vector<16x128xf32>
    %7 = arith.select %4, %0, %6 : vector<16x128xi1>, vector<16x128xf32>
    %8 = math.absf %0 : vector<16x128xf32>
    %cst_3 = arith.constant -2.000000e+00 : f32
    %9 = vector.broadcast %cst_3 : f32 to vector<16x128xf32>
    %10 = arith.mulf %9, %8 : vector<16x128xf32>
    %11 = math.exp %10 : vector<16x128xf32>
    %12 = math.log1p %11 : vector<16x128xf32>
    %13 = arith.addf %8, %12 : vector<16x128xf32>
    %14 = arith.subf %7, %13 : vector<16x128xf32>
    %cst_4 = arith.constant 1.000000e+00 : f32
    %15 = vector.broadcast %cst_4 : f32 to vector<16x128xf32>
    %16 = arith.addf %15, %11 : vector<16x128xf32>
    %cst_5 = arith.constant 1.000000e+00 : f32
    %17 = vector.broadcast %cst_5 : f32 to vector<16x128xf32>
    %18 = arith.divf %17, %16 : vector<16x128xf32>
    %cst_6 = arith.constant 0.000000e+00 : f32
    %19 = vector.broadcast %cst_6 : f32 to vector<16x128xf32>
    %20 = arith.cmpf oge, %7, %19 : vector<16x128xf32>
    %21 = arith.mulf %11, %18 : vector<16x128xf32>
    %22 = arith.select %20, %18, %21 : vector<16x128xi1>, vector<16x128xf32>
    %cst_7 = arith.constant 7.500000e-01 : f32
    %cst_8 = arith.constant 2.500000e-01 : f32
    %23 = vector.broadcast %cst_7 : f32 to vector<16x128xf32>
    %24 = vector.broadcast %cst_8 : f32 to vector<16x128xf32>
    %25 = arith.select %4, %23, %24 : vector<16x128xi1>, vector<16x128xf32>
    %26 = arith.mulf %14, %25 : vector<16x128xf32>
    %cst_9 = arith.constant 1.000000e+00 : f32
    %27 = vector.broadcast %cst_9 : f32 to vector<16x128xf32>
    %28 = arith.subf %27, %22 : vector<16x128xf32>
    %29 = arith.mulf %28, %28 : vector<16x128xf32>
    %cst_10 = arith.constant 0.000000e+00 : f32
    %30 = vector.broadcast %cst_10 : f32 to vector<16x128xf32>
    %31 = arith.subf %30, %29 : vector<16x128xf32>
    %32 = arith.mulf %31, %26 : vector<16x128xf32>
    %33 = vector.shape_cast %32 : vector<16x128xf32> to vector<2x8x128xf32>
    %cst_11 = arith.constant dense<0.000000e+00> : vector<8x128xf32>
    %34 = vector.multi_reduction <add>, %33, %cst_11 [0] : vector<2x8x128xf32> to vector<8x128xf32>
    %c0_12 = arith.constant 0 : index
    %c0_13 = arith.constant 0 : index
    %c0_14 = arith.constant 0 : index
    %35 = vector.load %arg3[%c0_12, %c0_13, %c0_14] : memref<1x8x128xf32, #tpu.memory_space<vmem>>, vector<1x8x128xf32>
    %36 = vector.shape_cast %35 : vector<1x8x128xf32> to vector<8x128xf32>
    %37 = vector.shape_cast %34 : vector<8x128xf32> to vector<1x8x128xf32>
    tpu.vector_store %arg3[%c0_12, %c0_13, %c0_14], %37 {strides = array<i32>} : memref<1x8x128xf32, #tpu.memory_space<vmem>>, vector<1x8x128xf32>,
    return
  }
  func.func @transform_0(%arg0: i32) -> (i32, i32) {
    %c0_i32 = arith.constant 0 : i32
    %c0_i32_0 = arith.constant 0 : i32
    return %arg0, %c0_i32 : i32, i32
  }
  func.func @transform_1(%arg0: i32) -> (i32, i32) {
    %c0_i32 = arith.constant 0 : i32
    %c0_i32_0 = arith.constant 0 : i32
    return %arg0, %c0_i32 : i32, i32
  }
  func.func @transform_2(%arg0: i32) -> (i32, i32, i32) {
    %c0_i32 = arith.constant 0 : i32
    %c0_i32_0 = arith.constant 0 : i32
    %c0_i32_1 = arith.constant 0 : i32
    return %arg0, %c0_i32, %c0_i32_0 : i32, i32, i32
  }
}

</mosaic_0001>

<bundles_post_ra>
// kernel: tpu_custom_call.1
= control target key start
LH: loop header
LB: loop body
LE: loop exit
PB: predicated region body
PF: predicated region fallthrough
CT: control target
= control target key end

     0   :  { %7 = vsyncpa [#allocation3], 0  ;;  %s295_s0 = inlined_call_operand.hbm [shape: f32[16,128], index: 0, kind: input, shape index: {}]   ;;  %s296_s1 = inlined_call_operand.hbm [shape: s8[16,128], index: 1, kind: input, shape index: {}]   ;;  %s297_s2 = inlined_call_operand.hbm [shape: f32[1,8,128], index: 2, kind: output, shape index: {}]  }
   0x1   :  { %8 = vsyncpa [#allocation6], 0 }
   0x2   :  { %9 = vsyncpa [#allocation4], 0  ;;  %s220_s9 = smov [#allocation2]   ;;  %s148_s13 = scalar_lea.hbm %s295_s0, 256 }
   0x3   :  { %s15_s10 = sshll.u32 %s220_s9, 4  ;;  %p149_p0 = scmp.ne.s32.totalorder %s295_s0, %s148_s13  ;;  %s16_s10 = int_to_ptr.vmem [resolvable:$true] %s15_s10 }
   0x4   :  { %p152_p1 = scmp.lt.u32.totalorder %s148_s13, %s295_s0 }
   0x6   :  { %p154_p2 = pnand %p152_p1, %p149_p0 }
   0x8   :  { %157 = shalt.err (!%p154_p2)
}
   0x9   :  { %s158_s18 = scalar_lea.vmem %s16_s10, 256  ;;  %p163_p4 = scmp.lt.s32.totalorder %s16_s10, %s16_s10 }
   0xa   :  { %p159_p3 = scmp.ne.s32.totalorder %s16_s10, %s158_s18  ;;  %p164_p5 = scmp.lt.s32.totalorder %s158_s18, %s158_s18 }
   0xc   :  { %p165_p6 = por %p164_p5, %p163_p4 }
   0xe   :  { %p166_p7 = pnand %p165_p6, %p159_p3 }
  0x10   :  { %169 = shalt.err (!%p166_p7)
}
  0x11   :  { %s221_s19 = smov 128   ;;  %s222_s20 = smov 8  }
  0x12   :  { %21 = dma.hbm_to_vmem [thread:$0]  %s295_s0, 256, %s16_s10, [#allocation3], %s221_s19, %s221_s19, %s222_s20  }
  0x13   :  { %s223_s23 = smov [#allocation5]   ;;  %s170_s27 = scalar_lea.hbm %s296_s1, 64 }
  0x14   :  { %s27_s24 = sshll.u32 %s223_s23, 4  ;;  %p171_p8 = scmp.ne.s32.totalorder %s296_s1, %s170_s27  ;;  %s28_s24 = int_to_ptr.vmem [resolvable:$true] %s27_s24 }
  0x15   :  { %p174_p9 = scmp.lt.u32.totalorder %s170_s27, %s296_s1 }
  0x17   :  { %p176_p10 = pnand %p174_p9, %p171_p8 }
  0x19   :  { %179 = shalt.err (!%p176_p10)
}
  0x1a   :  { %s180_s4 = scalar_lea.vmem %s28_s24, 64  ;;  %p185_p12 = scmp.lt.s32.totalorder %s28_s24, %s28_s24 }
  0x1b   :  { %p181_p11 = scmp.ne.s32.totalorder %s28_s24, %s180_s4  ;;  %p186_p13 = scmp.lt.s32.totalorder %s180_s4, %s180_s4 }
  0x1d   :  { %p187_p0 = por %p186_p13, %p185_p12 }
  0x1f   :  { %p188_p1 = pnand %p187_p0, %p181_p11 }
  0x21   :  { %191 = shalt.err (!%p188_p1)
}
  0x22   :  { %s224_s0 = smov 32   ;;  %s225_s5 = smov 2  }
  0x23   :  { %33 = dma.hbm_to_vmem [thread:$0]  %s296_s1, 64, %s28_s24, [#allocation6], %s224_s0, %s224_s0, %s225_s5  }
  0x24   :  { %214 = dma.done.wait [#allocation3], 256  }
  0x25   :  { %215 = vsyncadd [#allocation3], 4294967040 }
  0x26   :  { %216 = dma.done.wait [#allocation6], 64  }
  0x27   :  { %217 = vsyncadd [#allocation6], 4294967232  ;;  %v40_v0 = vld [vmem:[#allocation2] sm:$0xff]  ;;  %v41_v1 = vld [vmem:[#allocation2 + $0x8] sm:$0xff]  ;;  %v226_v42 = vmov 0.25   ;;  %s227_s1 = smov [#allocation7]  }
  0x28   :  { %v52_v2 = vand.u32 2147483647, %v40_v0  ;;  %v53_v3 = vand.u32 2147483647, %v41_v1  ;;  %v125_v11 = vld [vmem:[#allocation5] sm:$0xf]  }
  0x29   :  { %v126_v14 = vunpack.c.0.s8 %v125_v11  ;;  %v127_v16 = vunpack.c.1.s8 %v125_v11  ;;  %v48_v17 = vsub.f32 0.0, %v40_v0  ;;  %v49_v20 = vsub.f32 0.0, %v41_v1  ;;  %s114_s8 = sshll.u32 %s227_s1, 4  ;;  %s115_s8 = int_to_ptr.vmem [resolvable:$true] %s114_s8 }
  0x2a   :  { %v54_v4 = vmul.f32 -2.0, %v52_v2  ;;  %v55_v5 = vmul.f32 -2.0, %v53_v3  ;;  %s192_s9 = scalar_lea.vmem %s115_s8, 128  ;;  %p197_p3 = scmp.lt.s32.totalorder %s115_s8, %s115_s8 }
  0x2b   :  { %vm267_vm0 = vcmp.eq.s32.totalorder %v126_v14, 1  ;;  %vm271_vm1 = vcmp.eq.s32.totalorder %v127_v16, 1  ;;  %p193_p2 = scmp.ne.s32.totalorder %s115_s8, %s192_s9  ;;  %p198_p4 = scmp.lt.s32.totalorder %s192_s9, %s192_s9 }
  0x2c   :  { %v56_v6 = vmul.f32 1.442695, %v54_v4  ;;  %v58_v7 = vmul.f32 1.442695, %v55_v5  ;;  %v50_v25 = vsel %vm267_vm0, %v40_v0, %v48_v17  ;;  %v51_v28 = vsel %vm271_vm1, %v41_v1, %v49_v20 }
  0x2d   :  { %vm88_vm4 = vcmp.ge.f32.partialorder %v50_v25, 0.0  ;;  %vm89_vm5 = vcmp.ge.f32.partialorder %v51_v28, 0.0  ;;  %v94_v43 = vsel %vm267_vm0, 0.75, %v226_v42  ;;  %v95_v46 = vsel %vm271_vm1, 0.75, %v226_v42  ;;  %p199_p5 = por %p198_p4, %p197_p3 }
  0x2e   :  { %136 = vpow2.f32 %v56_v6 }
  0x2f   :  { %138 = vpow2.f32 %v58_v7  ;;  %p200_p6 = pnand %p199_p5, %p193_p2 }
  0x38   :  { %v137_v8 = vpop.eup %136 }
  0x39   :  { %v139_v9 = vpop.eup %138  ;;  %v60_v10 = vadd.f32 1.0, %v137_v8  ;;  %v63_v13 = vmul.f32 -0.5, %v137_v8  ;;  %v66_v21 = vand.u32 2147483647, %v137_v8 }
  0x3a   :  { %v69_v12 = vadd.f32 1.0, %v139_v9  ;;  %v72_v15 = vmul.f32 -0.5, %v139_v9  ;;  %v75_v24 = vand.u32 2147483647, %v139_v9 }
  0x3b   :  { %140 = vlog2.f32 %v60_v10  ;;  %v64_v18 = vadd.f32 1.0, %v63_v13  ;;  %vm67_vm2 = vcmp.lt.f32.partialorder %v66_v21, 0.0004427343 }
  0x3c   :  { %142 = vlog2.f32 %v69_v12  ;;  %v73_v22 = vadd.f32 1.0, %v72_v15  ;;  %vm76_vm3 = vcmp.lt.f32.partialorder %v75_v24, 0.0004427343 }
  0x3d   :  { %144 = vrcp.f32 %v60_v10  ;;  %v65_v26 = vmul.f32 %v137_v8, %v64_v18 }
  0x3e   :  { %146 = vrcp.f32 %v69_v12  ;;  %v74_v29 = vmul.f32 %v139_v9, %v73_v22 }
  0x45   :  { %v141_v27 = vpop.eup %140 }
  0x46   :  { %v143_v30 = vpop.eup %142  ;;  %v62_v31 = vmul.f32 0.6931472, %v141_v27 }
  0x47   :  { %v145_v32 = vpop.eup %144  ;;  %v71_v33 = vmul.f32 0.6931472, %v143_v30 }
  0x48   :  { %v147_v34 = vpop.eup %146  ;;  %v68_v35 = vsel %vm67_vm2, %v65_v26, %v62_v31  ;;  %v90_v36 = vmul.f32 %v145_v32, %v137_v8 }
  0x49   :  { %v77_v37 = vsel %vm76_vm3, %v74_v29, %v71_v33  ;;  %v78_v38 = vadd.f32 %v68_v35, %v52_v2  ;;  %v91_v39 = vmul.f32 %v147_v34, %v139_v9 }
  0x4a   :  { %v79_v40 = vadd.f32 %v77_v37, %v53_v3  ;;  %v92_v41 = vsel %vm88_vm4, %v145_v32, %v90_v36 }
  0x4b   :  { %v80_v44 = vsub.f32 %v50_v25, %v78_v38  ;;  %v93_v45 = vsel %vm89_vm5, %v147_v34, %v91_v39  ;;  %v98_v47 = vsub.f32 1.0, %v92_v41 }
  0x4c   :  { %v81_v48 = vsub.f32 %v51_v28, %v79_v40  ;;  %v99_v49 = vsub.f32 1.0, %v93_v45 }
  0x4d   :  { %v96_v50 = vmul.f32 %v94_v43, %v80_v44  ;;  %v100_v51 = vmul.f32 %v98_v47, %v98_v47 }
  0x4e   :  { %v97_v52 = vmul.f32 %v95_v46, %v81_v48  ;;  %v101_v53 = vmul.f32 %v99_v49, %v99_v49 }
  0x4f   :  { %v102_v54 = vsub.f32 0.0, %v100_v51 }
  0x50   :  { %v103_v55 = vsub.f32 0.0, %v101_v53 }
  0x51   :  { %v104_v56 = vmul.f32 %v102_v54, %v96_v50 }
  0x52   :  { %v105_v57 = vmul.f32 %v103_v55, %v97_v52 }
  0x54   :  { %v106_v58 = vadd.f32 %v105_v57, %v104_v56 }
  0x56   :  { %107 = vst [vmem:[#allocation7] sm:$0xff] %v106_v58 }
  0x57   :  { %203 = shalt.err (!%p200_p6)
}
  0x58   :  { %s204_s12 = scalar_lea.hbm %s297_s2, 128 }
  0x59   :  { %p205_p7 = scmp.ne.s32.totalorder %s297_s2, %s204_s12  ;;  %p208_p8 = scmp.lt.u32.totalorder %s204_s12, %s297_s2 }
  0x5b   :  { %p210_p9 = pnand %p208_p8, %p205_p7 }
  0x5d   :  { %213 = shalt.err (!%p210_p9)
}
  0x5e   :  { %117 = dma.vmem_to_hbm [thread:$0]  %s115_s8, 128, %s297_s2, [#allocation4]  }
  0x5f   :  { %218 = dma.done.wait [#allocation4], 128  }
  0x60   :  { %219 = vsyncadd [#allocation4], 4294967168 }
  0x61   :  { %121 = vsyncpa [#allocation3], 1 }
  0x62   :  { %122 = vsyncpa [#allocation6], 1 }
  0x63   :  { %123 = vsyncpa [#allocation4], 1 }

</bundles_post_ra>
